<compile_context>
chip_gen: v5e
topology: v5e:2x2
jax: 0.10.0
libtpu: 0.0.40
codegen_flags: <defaults>
</compile_context>

<pallas_src>
import numpy as np
import jax
import jax.numpy as jnp
from jax.experimental import pallas as pl
from jax.experimental.pallas import tpu as pltpu

# Deterministic buffers from the module's __init__.
_LAPLACIAN = ((-1.0, -1.0, -1.0),
              (-1.0,  8.0, -1.0),
              (-1.0, -1.0, -1.0))
_FUSE = (6.0 / 10.0, 3.0 / 10.0, 1.0 / 10.0)
_ALPHA = 0.25   # focal-loss default; gamma == 2 is an explicit square below


# ---------------------------------------------------------------------------
# Constant matrices: strided-SAME subsampling and align_corners bilinear
# upsampling expressed as linear maps.
# ---------------------------------------------------------------------------
def _subsample_matrix(n_in, stride):
    """SAME-padded stride-s 3-tap conv == stride-1 SAME conv subsampled with an offset."""
    n_out = -(-n_in // stride)
    pad_total = max((n_out - 1) * stride + 3 - n_in, 0)
    pad_before = pad_total // 2
    offset = 1 - pad_before          # index into the stride-1 SAME conv output
    m = np.zeros((n_out, n_in), np.float32)
    for i in range(n_out):
        idx = offset + i * stride
        assert 0 <= idx < n_in
        m[i, idx] = 1.0
    return m


def _upsample_matrix(n_out, n_in):
    """Bilinear interpolation matrix, align_corners=True."""
    m = np.zeros((n_out, n_in), np.float32)
    if n_in == 1:
        m[:, 0] = 1.0
        return m
    scale = (n_in - 1) / (n_out - 1)
    for i in range(n_out):
        src = i * scale
        j0 = min(int(np.floor(src)), n_in - 1)
        j1 = min(j0 + 1, n_in - 1)
        f = src - j0
        m[i, j0] += 1.0 - f
        m[i, j1] += f
    return m


def _make_branch2_matrices(H, W):
    """Constants for the kernel's stride-2 branch (f32 operands, f32 accumulation)."""
    s2w = _subsample_matrix(W, 2)          # (W/2, W) one-hot lane selector
    u2w = _upsample_matrix(W, W // 2)      # (W, W/2) align_corners bilinear
    u2h = _upsample_matrix(H, H // 2)      # (H, H/2)
    w2 = (u2w @ s2w).T                     # (W, W): lane subsample folded into the upsample
    return jnp.asarray(w2, jnp.float32), jnp.asarray(u2h, jnp.float32)


def _make_matrices(H, W):
    """All subsample/upsample maps (used by the pure-JAX reference only)."""
    s2h, s2w = _subsample_matrix(H, 2), _subsample_matrix(W, 2)
    s4h, s4w = _subsample_matrix(H, 4), _subsample_matrix(W, 4)
    u2h, u2w = _upsample_matrix(H, s2h.shape[0]), _upsample_matrix(W, s2w.shape[0])
    u4h, u4w = _upsample_matrix(H, s4h.shape[0]), _upsample_matrix(W, s4w.shape[0])
    return (jnp.asarray(s2h), jnp.asarray(s2w.T), jnp.asarray(u2h), jnp.asarray(u2w.T),
            jnp.asarray(s4h), jnp.asarray(s4w.T), jnp.asarray(u4h), jnp.asarray(u4w.T))


def _vmem_limit_bytes():
    """Generation-aware VMEM ceiling: v7x has 64 MiB per TensorCore, v5e/v6e have 128 MiB."""
    cap = 128 * 1024 * 1024
    try:
        cap = int(getattr(pltpu.get_tpu_info(), "vmem_capacity_bytes", cap))
    except Exception:
        pass
    return (40 if cap <= 64 * 1024 * 1024 else 48) * 1024 * 1024


def _pick_batch_tile(N, H, W, vmem_limit):
    """Images folded into one grid step: amortize the ~0.35us/step overhead for small images
    while staying inside the per-generation VMEM budget; keep G >= 2 so both v7x cores work."""
    per_image = 44 * H * W                          # dbl-buffered blocks + scratches + f32 temps
    const_bytes = 2 * 4 * (W * W + H * (H // 2))    # double-buffered f32 w2 / u2h constants
    budget = vmem_limit - const_bytes - (4 << 20)   # headroom: out blocks, internal scratch
    max_bt = 1
    if budget > per_image:
        max_bt = int(min(8, max(1, budget // per_image)))
    if N >= 2:
        max_bt = max(1, min(max_bt, N // 2))        # G = N // bt >= 2 (v7x megacore sharding)
    for cand in range(int(max_bt), 0, -1):
        if N % cand == 0:
            return cand
    return 1


# ---------------------------------------------------------------------------
# Pallas kernel: one grid step per batch tile; whole (H, W) images in VMEM.
# ---------------------------------------------------------------------------
def _edge_detail_kernel(no_ref, ts_ref, w2_ref, u2h_ref, out_ref,
                        tpad_ref, full_ref, x2_ref):
    bt, H, W = no_ref.shape
    H2 = H // 2

    # ---- SAME-padding border lives only in a VMEM scratch (no padded HBM layout) ----
    tpad_ref[:, 0:1, :] = jnp.zeros((bt, 1, W + 2), jnp.float32)
    tpad_ref[:, H + 1:H + 2, :] = jnp.zeros((bt, 1, W + 2), jnp.float32)
    tpad_ref[:, :, 0:1] = jnp.zeros((bt, H + 2, 1), jnp.float32)
    tpad_ref[:, :, W + 1:W + 2] = jnp.zeros((bt, H + 2, 1), jnp.float32)
    tpad_ref[:, 1:H + 1, 1:W + 1] = ts_ref[...]          # channel-summed targets, dense DMA

    # ---- stride-1 3x3 laplacian, SAME padding, on the channel-summed targets ----
    # L = 9*delta_center - ones(3,3)  ->  full = 9*t - box3x3(t), box separable.
    tp = tpad_ref[...]                                    # (bt, H+2, W+2)
    mid = tp[:, :, 1:W + 1]                               # middle lane tap (reused as center)
    hs = tp[:, :, 0:W] + mid + tp[:, :, 2:W + 2]          # horizontal 3-tap, (bt, H+2, W)
    box = hs[:, 0:H, :] + hs[:, 1:H + 1, :] + hs[:, 2:H + 2, :]     # vertical 3-tap
    full_ref[...] = (9.0 * mid[:, 1:H + 1, :] - box).reshape(bt * H, W)

    # ---- stride-2 branch: stride-2 SAME conv == full[1::2, 1::2]; clamp commutes with the
    # pure gather.  Row subsample: strided VMEM load.  Lane subsample is folded into w2. ----
    rows2 = jnp.clip(full_ref[pl.ds(1, bt * H2, stride=2), :], 0.0, 1.0)
    x2_ref[...] = jnp.dot(rows2, w2_ref[...], preferred_element_type=jnp.float32)

    # ---- per-image: H-upsample, fuse (== b1 | b2; stride-4 branch is dead), focal loss ----
    u2h = u2h_ref[...]                                    # (H, H//2), hoisted out of the loop

    def body(i, acc):
        x2_i = x2_ref[pl.ds(i * H2, H2), :]               # (H2, W)
        up2 = jnp.dot(u2h, x2_i, preferred_element_type=jnp.float32)    # (H, W)
        b1 = full_ref[pl.ds(i * H, H), :] > 0.1           # clip(x,0,1) > .1  ==  x > .1
        tgt = jnp.logical_or(b1, up2 > 0.1).astype(jnp.float32)

        # focal loss (from_logits=False, alpha=0.25, gamma=2, reduction='sum')
        p = no_ref[i]                                     # (H, W) probabilities
        p_t = p * tgt + (1.0 - p) * (1.0 - tgt)
        ce = jnp.minimum(-jnp.log(p_t), 100.0)            # single clamped BCE log
        alpha_t = 0.75 - 0.5 * tgt                        # 0.25*tgt + 0.75*(1-tgt)
        loss = (alpha_t * ce) * ((1.0 - p_t) * (1.0 - p_t))
        return acc + jnp.sum(loss, axis=(0, 1), keepdims=True)

    total = jax.lax.fori_loop(0, bt, body, jnp.zeros((1, 1), jnp.float32), unroll=True)
    out_ref[...] = jnp.broadcast_to(total.reshape(1, 1, 1), out_ref.shape)


@jax.jit
def edge_detail_aggregate_loss(network_output, targets):
    """network_output: (N, H, W, 1) probs; targets: (N, H, W, C>=2). Returns scalar loss."""
    N, H, W, _ = network_output.shape
    assert targets.shape[:3] == (N, H, W) and targets.shape[3] >= 2
    assert H % 4 == 0 and W % 4 == 0
    # The kernel hardcodes the stride-2 SAME-conv offset (output r <-> full-res 1 + 2r).
    assert int(np.nonzero(_subsample_matrix(H, 2)[0])[0][0]) == 1
    # fuse(0.6*b1 + 0.3*b2 + 0.1*b4) > 0.1 == b1 | b2 only for these weights: guard the
    # stride-4 branch elision against future weight changes.
    assert _FUSE[0] > 0.1 and _FUSE[1] > 0.1 and _FUSE[2] <= 0.1

    vmem_limit = _vmem_limit_bytes()
    bt = _pick_batch_tile(N, H, W, vmem_limit)
    G = N // bt
    H2 = H // 2

    # Predictions and channel-summed targets (laplacian is identical & linear per channel).
    # The channel sum is the only HBM intermediate: no spatial padding, no 128-lane round-up.
    no = network_output[..., 0].astype(jnp.float32)                   # (N, H, W)
    tsum = (targets[..., 0] + targets[..., 1]).astype(jnp.float32)    # (N, H, W)

    w2, u2h = _make_branch2_matrices(H, W)

    out = pl.pallas_call(
        _edge_detail_kernel,
        out_shape=jax.ShapeDtypeStruct((G, 1, 128), jnp.float32),
        grid=(G,),
        in_specs=[
            pl.BlockSpec((bt, H, W), lambda g: (g, 0, 0)),       # predictions
            pl.BlockSpec((bt, H, W), lambda g: (g, 0, 0)),       # channel-summed targets
            pl.BlockSpec((W, W), lambda g: (0, 0)),              # folded lane subsample+upsample
            pl.BlockSpec((H, H2), lambda g: (0, 0)),             # row upsample
        ],
        out_specs=pl.BlockSpec((1, 1, 128), lambda g: (g, 0, 0)),
        scratch_shapes=[
            pltpu.VMEM((bt, H + 2, W + 2), jnp.float32),   # SAME-padded targets (in-VMEM only)
            pltpu.VMEM((bt * H, W), jnp.float32),          # full-res laplacian (b1 + subsample)
            pltpu.VMEM((bt * H2, W), jnp.float32),         # lane-upsampled stride-2 rows
        ],
        compiler_params=pltpu.CompilerParams(
            dimension_semantics=("parallel",),        # shard batch tiles across v7x cores
            vmem_limit_bytes=vmem_limit),
    )(no, tsum, w2, u2h)
    return jnp.sum(out[:, 0, 0])


# ---------------------------------------------------------------------------
# Pure-JAX reference (full 3-level pyramid, f32 highest precision) for a sanity check.
# ---------------------------------------------------------------------------
def _reference_loss(network_output, targets):
    N, H, W, _ = network_output.shape
    s2h, s2wt, u2h, u2wt, s4h, s4wt, u4h, u4wt = _make_matrices(H, W)
    t = jnp.transpose(targets[..., 0:2], (0, 3, 1, 2)).astype(jnp.float32)
    tp = jnp.pad(t, ((0, 0), (0, 0), (1, 1), (1, 1)))
    full = jnp.zeros((N, H, W), jnp.float32)
    for c in range(2):
        for dh in range(3):
            for dw in range(3):
                full = full + _LAPLACIAN[dh][dw] * tp[:, c, dh:dh + H, dw:dw + W]
    b1 = (jnp.clip(full, 0.0, 1.0) > 0.1).astype(jnp.float32)

    def branch(sh, swt, uh, uwt):
        small = jnp.einsum('ij,njk,kl->nil', sh, full, swt, precision='highest')
        small = jnp.clip(small, 0.0, 1.0)
        up = jnp.einsum('ij,njk,kl->nil', uh, small, uwt, precision='highest')
        return (up > 0.1).astype(jnp.float32)

    b2 = branch(s2h, s2wt, u2h, u2wt)
    b4 = branch(s4h, s4wt, u4h, u4wt)
    tgt = ((_FUSE[0] * b1 + _FUSE[1] * b2 + _FUSE[2] * b4) > 0.1).astype(jnp.float32)
    p = network_output[..., 0].astype(jnp.float32)
    log_p = jnp.maximum(jnp.log(p), -100.0)
    log_1mp = jnp.maximum(jnp.log(1.0 - p), -100.0)
    ce = -(tgt * log_p + (1.0 - tgt) * log_1mp)
    p_t = p * tgt + (1.0 - p) * (1.0 - tgt)
    loss = ce * (1.0 - p_t) * (1.0 - p_t)
    loss = (_ALPHA * tgt + (1.0 - _ALPHA) * (1.0 - tgt)) * loss
    return jnp.sum(loss)


if __name__ == "__main__":
    key = jax.random.PRNGKey(0)
    k1, k2 = jax.random.split(key)
    N, H, W, C = 2, 16, 16, 3
    # layout: NHWC
    network_output = jax.nn.sigmoid(jax.random.normal(k1, (N, H, W, 1), jnp.float32))
    targets = jax.random.uniform(k2, (N, H, W, C), dtype=jnp.float32)

    loss = edge_detail_aggregate_loss(network_output, targets)
    loss = jax.block_until_ready(loss)

    ref = _reference_loss(network_output, targets)
    # All kernel matmuls now use f32 operands with f32 accumulation, so the only expected
    # deltas are accumulation-order / MXU-precision effects (thresholded targets make a flip
    # essentially impossible for generic random inputs).
    np.testing.assert_allclose(np.asarray(loss), np.asarray(ref), rtol=2e-2, atol=1e-2)
    print("KERNEL_OK")
</pallas_src>

<mosaic_0001>
module attributes {stable_mosaic.version = 11 : i64} {
  func.func @_edge_detail_kernel(%arg0: i32, %arg1: memref<1x16x16xf32, #tpu.memory_space<vmem>>, %arg2: memref<1x16x16xf32, #tpu.memory_space<vmem>>, %arg3: memref<16x16xf32, #tpu.memory_space<vmem>>, %arg4: memref<16x8xf32, #tpu.memory_space<vmem>>, %arg5: memref<1x1x128xf32, #tpu.memory_space<vmem>>, %arg6: memref<1x18x18xf32, #tpu.memory_space<vmem>>, %arg7: memref<16x16xf32, #tpu.memory_space<vmem>>, %arg8: memref<8x16xf32, #tpu.memory_space<vmem>>) attributes {dimension_semantics = [#tpu.dimension_semantics<parallel>], iteration_bounds = array<i64: 2>, scalar_prefetch = 0 : i64, scratch_operands = 3 : i64, tpu.core_type = #tpu.core_type<tc>, window_params = [{transform_indices = @transform_0, window_bounds = array<i64: 1, 16, 16>}, {transform_indices = @transform_1, window_bounds = array<i64: 1, 16, 16>}, {pipeline_mode = #tpu.pipeline_mode<synchronous>, transform_indices = @transform_2, window_bounds = array<i64: 16, 16>}, {pipeline_mode = #tpu.pipeline_mode<synchronous>, transform_indices = @transform_3, window_bounds = array<i64: 16, 8>}, {transform_indices = @transform_4, window_bounds = array<i64: 1, 1, 128>}]} {
    %cst = arith.constant 0.000000e+00 : f32
    %0 = vector.broadcast %cst : f32 to vector<1x1x18xf32>
    %c0 = arith.constant 0 : index
    %c0_0 = arith.constant 0 : index
    %c0_1 = arith.constant 0 : index
    %1 = vector.load %arg6[%c0, %c0_0, %c0_1] : memref<1x18x18xf32, #tpu.memory_space<vmem>>, vector<1x1x18xf32>
    tpu.vector_store %arg6[%c0, %c0_0, %c0_1], %0 {strides = array<i32>} : memref<1x18x18xf32, #tpu.memory_space<vmem>>, vector<1x1x18xf32>,
    %cst_2 = arith.constant 0.000000e+00 : f32
    %2 = vector.broadcast %cst_2 : f32 to vector<1x1x18xf32>
    %c0_3 = arith.constant 0 : index
    %c17 = arith.constant 17 : index
    %c0_4 = arith.constant 0 : index
    %3 = vector.load %arg6[%c0_3, %c17, %c0_4] : memref<1x18x18xf32, #tpu.memory_space<vmem>>, vector<1x1x18xf32>
    tpu.vector_store %arg6[%c0_3, %c17, %c0_4], %2 {strides = array<i32>} : memref<1x18x18xf32, #tpu.memory_space<vmem>>, vector<1x1x18xf32>,
    %cst_5 = arith.constant 0.000000e+00 : f32
    %4 = vector.broadcast %cst_5 : f32 to vector<1x18x1xf32>
    %c0_6 = arith.constant 0 : index
    %c0_7 = arith.constant 0 : index
    %c0_8 = arith.constant 0 : index
    %5 = vector.load %arg6[%c0_6, %c0_7, %c0_8] : memref<1x18x18xf32, #tpu.memory_space<vmem>>, vector<1x18x1xf32>
    tpu.vector_store %arg6[%c0_6, %c0_7, %c0_8], %4 {strides = array<i32>} : memref<1x18x18xf32, #tpu.memory_space<vmem>>, vector<1x18x1xf32>,
    %cst_9 = arith.constant 0.000000e+00 : f32
    %6 = vector.broadcast %cst_9 : f32 to vector<1x18x1xf32>
    %c0_10 = arith.constant 0 : index
    %c0_11 = arith.constant 0 : index
    %c17_12 = arith.constant 17 : index
    %7 = vector.load %arg6[%c0_10, %c0_11, %c17_12] : memref<1x18x18xf32, #tpu.memory_space<vmem>>, vector<1x18x1xf32>
    tpu.vector_store %arg6[%c0_10, %c0_11, %c17_12], %6 {strides = array<i32>} : memref<1x18x18xf32, #tpu.memory_space<vmem>>, vector<1x18x1xf32>,
    %c0_13 = arith.constant 0 : index
    %c0_14 = arith.constant 0 : index
    %c0_15 = arith.constant 0 : index
    %8 = vector.load %arg2[%c0_13, %c0_14, %c0_15] : memref<1x16x16xf32, #tpu.memory_space<vmem>>, vector<1x16x16xf32>
    %c0_16 = arith.constant 0 : index
    %c1 = arith.constant 1 : index
    %c1_17 = arith.constant 1 : index
    %9 = vector.load %arg6[%c0_16, %c1, %c1_17] : memref<1x18x18xf32, #tpu.memory_space<vmem>>, vector<1x16x16xf32>
    tpu.vector_store %arg6[%c0_16, %c1, %c1_17], %8 {strides = array<i32>} : memref<1x18x18xf32, #tpu.memory_space<vmem>>, vector<1x16x16xf32>,
    %c0_18 = arith.constant 0 : index
    %c0_19 = arith.constant 0 : index
    %c0_20 = arith.constant 0 : index
    %10 = vector.load %arg6[%c0_18, %c0_19, %c0_20] : memref<1x18x18xf32, #tpu.memory_space<vmem>>, vector<1x18x18xf32>
    %11 = vector.extract_strided_slice %10 {offsets = [0, 0, 1], sizes = [1, 18, 16], strides = [1, 1, 1]} : vector<1x18x18xf32> to vector<1x18x16xf32>
    %12 = vector.extract_strided_slice %10 {offsets = [0, 0, 0], sizes = [1, 18, 16], strides = [1, 1, 1]} : vector<1x18x18xf32> to vector<1x18x16xf32>
    %13 = arith.addf %12, %11 : vector<1x18x16xf32>
    %14 = vector.extract_strided_slice %10 {offsets = [0, 0, 2], sizes = [1, 18, 16], strides = [1, 1, 1]} : vector<1x18x18xf32> to vector<1x18x16xf32>
    %15 = arith.addf %13, %14 : vector<1x18x16xf32>
    %16 = vector.extract_strided_slice %15 {offsets = [0, 0, 0], sizes = [1, 16, 16], strides = [1, 1, 1]} : vector<1x18x16xf32> to vector<1x16x16xf32>
    %17 = vector.extract_strided_slice %15 {offsets = [0, 1, 0], sizes = [1, 16, 16], strides = [1, 1, 1]} : vector<1x18x16xf32> to vector<1x16x16xf32>
    %18 = arith.addf %16, %17 : vector<1x16x16xf32>
    %19 = vector.extract_strided_slice %15 {offsets = [0, 2, 0], sizes = [1, 16, 16], strides = [1, 1, 1]} : vector<1x18x16xf32> to vector<1x16x16xf32>
    %20 = arith.addf %18, %19 : vector<1x16x16xf32>
    %21 = vector.extract_strided_slice %11 {offsets = [0, 1, 0], sizes = [1, 16, 16], strides = [1, 1, 1]} : vector<1x18x16xf32> to vector<1x16x16xf32>
    %cst_21 = arith.constant 9.000000e+00 : f32
    %22 = vector.broadcast %cst_21 : f32 to vector<1x16x16xf32>
    %23 = arith.mulf %22, %21 : vector<1x16x16xf32>
    %24 = arith.subf %23, %20 : vector<1x16x16xf32>
    %25 = vector.shape_cast %24 : vector<1x16x16xf32> to vector<16x16xf32>
    %c0_22 = arith.constant 0 : index
    %c0_23 = arith.constant 0 : index
    %26 = vector.load %arg7[%c0_22, %c0_23] : memref<16x16xf32, #tpu.memory_space<vmem>>, vector<16x16xf32>
    tpu.vector_store %arg7[%c0_22, %c0_23], %25 {strides = array<i32>} : memref<16x16xf32, #tpu.memory_space<vmem>>, vector<16x16xf32>,
    %c1_24 = arith.constant 1 : index
    %c0_25 = arith.constant 0 : index
    %27 = tpu.strided_load %arg7[%c1_24, %c0_25] {strides = array<i32: 2, 1>} : memref<16x16xf32, #tpu.memory_space<vmem>>, vector<8x16xf32>
    %cst_26 = arith.constant 0.000000e+00 : f32
    %cst_27 = arith.constant 1.000000e+00 : f32
    %28 = vector.broadcast %cst_26 : f32 to vector<8x16xf32>
    %29 = arith.maximumf %28, %27 : vector<8x16xf32>
    %30 = vector.broadcast %cst_27 : f32 to vector<8x16xf32>
    %31 = arith.minimumf %30, %29 : vector<8x16xf32>
    %c0_28 = arith.constant 0 : index
    %c0_29 = arith.constant 0 : index
    %32 = vector.load %arg3[%c0_28, %c0_29] : memref<16x16xf32, #tpu.memory_space<vmem>>, vector<16x16xf32>
    %cst_30 = arith.constant dense<0.000000e+00> : vector<8x16xf32>
    %33 = tpu.matmul %31, %32, %cst_30 {dimension_numbers = #tpu.dot_dimension_numbers<[1], [0], [0], [1], [0, 0, 1, 1], [], []>} : vector<8x16xf32>, vector<16x16xf32>, vector<8x16xf32> -> vector<8x16xf32>
    %c0_31 = arith.constant 0 : index
    %c0_32 = arith.constant 0 : index
    %34 = vector.load %arg8[%c0_31, %c0_32] : memref<8x16xf32, #tpu.memory_space<vmem>>, vector<8x16xf32>
    tpu.vector_store %arg8[%c0_31, %c0_32], %33 {strides = array<i32>} : memref<8x16xf32, #tpu.memory_space<vmem>>, vector<8x16xf32>,
    %c0_33 = arith.constant 0 : index
    %c0_34 = arith.constant 0 : index
    %35 = vector.load %arg4[%c0_33, %c0_34] : memref<16x8xf32, #tpu.memory_space<vmem>>, vector<16x8xf32>
    %cst_35 = arith.constant 0.000000e+00 : f32
    %36 = vector.broadcast %cst_35 : f32 to vector<1x1xf32>
    %c0_i32 = arith.constant 0 : i32
    %c8_i32 = arith.constant 8 : i32
    %37 = arith.muli %c0_i32, %c8_i32 : i32
    %38 = arith.index_cast %37 : i32 to index
    %c0_36 = arith.constant 0 : index
    %39 = vector.load %arg8[%38, %c0_36] : memref<8x16xf32, #tpu.memory_space<vmem>>, vector<8x16xf32>
    %cst_37 = arith.constant dense<0.000000e+00> : vector<16x16xf32>
    %40 = tpu.matmul %35, %39, %cst_37 {dimension_numbers = #tpu.dot_dimension_numbers<[1], [0], [0], [1], [0, 0, 1, 1], [], []>} : vector<16x8xf32>, vector<8x16xf32>, vector<16x16xf32> -> vector<16x16xf32>
    %c16_i32 = arith.constant 16 : i32
    %41 = arith.muli %c0_i32, %c16_i32 : i32
    %42 = arith.index_cast %41 : i32 to index
    %c0_38 = arith.constant 0 : index
    %43 = vector.load %arg7[%42, %c0_38] : memref<16x16xf32, #tpu.memory_space<vmem>>, vector<16x16xf32>
    %cst_39 = arith.constant 1.000000e-01 : f32
    %44 = vector.broadcast %cst_39 : f32 to vector<16x16xf32>
    %45 = arith.cmpf ogt, %43, %44 : vector<16x16xf32>
    %cst_40 = arith.constant 1.000000e-01 : f32
    %46 = vector.broadcast %cst_40 : f32 to vector<16x16xf32>
    %47 = arith.cmpf ogt, %40, %46 : vector<16x16xf32>
    %48 = arith.ori %45, %47 : vector<16x16xi1>
    %49 = arith.extui %48 : vector<16x16xi1> to vector<16x16xi32>
    %50 = arith.sitofp %49 : vector<16x16xi32> to vector<16x16xf32>
    %51 = arith.index_cast %c0_i32 : i32 to index
    %c0_41 = arith.constant 0 : index
    %c0_42 = arith.constant 0 : index
    %52 = vector.load %arg1[%51, %c0_41, %c0_42] : memref<1x16x16xf32, #tpu.memory_space<vmem>>, vector<1x16x16xf32>
    %53 = vector.shape_cast %52 : vector<1x16x16xf32> to vector<16x16xf32>
    %54 = arith.mulf %53, %50 : vector<16x16xf32>
    %cst_43 = arith.constant 1.000000e+00 : f32
    %55 = vector.broadcast %cst_43 : f32 to vector<16x16xf32>
    %56 = arith.subf %55, %53 : vector<16x16xf32>
    %cst_44 = arith.constant 1.000000e+00 : f32
    %57 = vector.broadcast %cst_44 : f32 to vector<16x16xf32>
    %58 = arith.subf %57, %50 : vector<16x16xf32>
    %59 = arith.mulf %56, %58 : vector<16x16xf32>
    %60 = arith.addf %54, %59 : vector<16x16xf32>
    %61 = math.log %60 : vector<16x16xf32>
    %cst_45 = arith.constant 0.000000e+00 : f32
    %62 = vector.broadcast %cst_45 : f32 to vector<16x16xf32>
    %63 = arith.subf %62, %61 : vector<16x16xf32>
    %cst_46 = arith.constant 1.000000e+02 : f32
    %64 = vector.broadcast %cst_46 : f32 to vector<16x16xf32>
    %65 = arith.minimumf %63, %64 : vector<16x16xf32>
    %cst_47 = arith.constant 5.000000e-01 : f32
    %66 = vector.broadcast %cst_47 : f32 to vector<16x16xf32>
    %67 = arith.mulf %66, %50 : vector<16x16xf32>
    %cst_48 = arith.constant 7.500000e-01 : f32
    %68 = vector.broadcast %cst_48 : f32 to vector<16x16xf32>
    %69 = arith.subf %68, %67 : vector<16x16xf32>
    %70 = arith.mulf %69, %65 : vector<16x16xf32>
    %cst_49 = arith.constant 1.000000e+00 : f32
    %71 = vector.broadcast %cst_49 : f32 to vector<16x16xf32>
    %72 = arith.subf %71, %60 : vector<16x16xf32>
    %cst_50 = arith.constant 1.000000e+00 : f32
    %73 = vector.broadcast %cst_50 : f32 to vector<16x16xf32>
    %74 = arith.subf %73, %60 : vector<16x16xf32>
    %75 = arith.mulf %72, %74 : vector<16x16xf32>
    %76 = arith.mulf %70, %75 : vector<16x16xf32>
    %77 = vector.shape_cast %76 : vector<16x16xf32> to vector<1x16x16xf32>
    %cst_51 = arith.constant dense<0.000000e+00> : vector<1xf32>
    %78 = vector.multi_reduction <add>, %77, %cst_51 [1, 2] : vector<1x16x16xf32> to vector<1xf32>
    %79 = vector.shape_cast %78 : vector<1xf32> to vector<1x1x1xf32>
    %80 = vector.extract %79[0, 0, 0] : f32 from vector<1x1x1xf32>
    %81 = vector.broadcast %80 : f32 to vector<1x1xf32>
    %82 = arith.addf %36, %81 : vector<1x1xf32>
    %c1_i32 = arith.constant 1 : i32
    %83 = vector.shape_cast %82 : vector<1x1xf32> to vector<1x1x1xf32>
    %84 = vector.shape_cast %83 : vector<1x1x1xf32> to vector<1x1x1xf32>
    %85 = vector.broadcast %84 : vector<1x1x1xf32> to vector<1x1x128xf32>
    %c0_52 = arith.constant 0 : index
    %c0_53 = arith.constant 0 : index
    %c0_54 = arith.constant 0 : index
    %86 = vector.load %arg5[%c0_52, %c0_53, %c0_54] : memref<1x1x128xf32, #tpu.memory_space<vmem>>, vector<1x1x128xf32>
    tpu.vector_store %arg5[%c0_52, %c0_53, %c0_54], %85 {strides = array<i32>} : memref<1x1x128xf32, #tpu.memory_space<vmem>>, vector<1x1x128xf32>,
    return
  }
  func.func @transform_0(%arg0: i32) -> (i32, i32, i32) {
    %c0_i32 = arith.constant 0 : i32
    %c0_i32_0 = arith.constant 0 : i32
    %c0_i32_1 = arith.constant 0 : i32
    return %arg0, %c0_i32, %c0_i32_0 : i32, i32, i32
  }
  func.func @transform_1(%arg0: i32) -> (i32, i32, i32) {
    %c0_i32 = arith.constant 0 : i32
    %c0_i32_0 = arith.constant 0 : i32
    %c0_i32_1 = arith.constant 0 : i32
    return %arg0, %c0_i32, %c0_i32_0 : i32, i32, i32
  }
  func.func @transform_2(%arg0: i32) -> (i32, i32) {
    %c0_i32 = arith.constant 0 : i32
    %c0_i32_0 = arith.constant 0 : i32
    %c0_i32_1 = arith.constant 0 : i32
    return %c0_i32, %c0_i32_0 : i32, i32
  }
  func.func @transform_3(%arg0: i32) -> (i32, i32) {
    %c0_i32 = arith.constant 0 : i32
    %c0_i32_0 = arith.constant 0 : i32
    %c0_i32_1 = arith.constant 0 : i32
    return %c0_i32, %c0_i32_0 : i32, i32
  }
  func.func @transform_4(%arg0: i32) -> (i32, i32, i32) {
    %c0_i32 = arith.constant 0 : i32
    %c0_i32_0 = arith.constant 0 : i32
    %c0_i32_1 = arith.constant 0 : i32
    return %arg0, %c0_i32, %c0_i32_0 : i32, i32, i32
  }
}

</mosaic_0001>

<bundles_post_ra>
// kernel: edge_detail_aggregate_loss.1
= control target key start
LH: loop header
LB: loop body
LE: loop exit
PB: predicated region body
PF: predicated region fallthrough
CT: control target
= control target key end

     0   :  { %s587_s15 = smov 0   ;;  %s655_s0 = inlined_call_operand.vmem [shape: f32[2,16,16], index: 0, kind: input, shape index: {}]   ;;  %s656_s1 = inlined_call_operand.vmem [shape: f32[2,16,16], index: 1, kind: input, shape index: {}]   ;;  %s657_s2 = inlined_call_operand.vmem [shape: f32[16,16], index: 2, kind: input, shape index: {}]   ;;  %s658_s3 = inlined_call_operand.vmem [shape: f32[16,8], index: 3, kind: input, shape index: {}]   ;;  %s659_s4 = inlined_call_operand.vmem [shape: f32[2,1,128], index: 4, kind: output, shape index: {}]  }
   0x1 LB: > { %s513_s16 = sadd.s32 4294967295, %s556_s15   ;;  %p517_p0 = scmp.ge.s32.totalorder %s556_s15, 1  ;;  %s556_s15 = sphi %s587_s15, %s14_s15  }
   0x2   : > { %p172_p1 = scmp.lt.s32.totalorder %s556_s15, 3 }
   0x4   : > { %p173_p2 = pnand %p517_p0, %p172_p1 }
   0x5   : > { %p201_p3 = scmp.lt.s32.totalorder (!%p173_p2), %s513_s16, 1  ;;  %s559_s21 = smov (!%p173_p2), 1  }
   0x6   : > { %176 = sbr.rel (%p173_p2) target bundleno = 1002 (0x3ea), region = 36  ;;  %s560_s22 = smov (!%p173_p2), 127  }
   0x7   : > { %s561_s23 = smov (!%p173_p2), 126  }
   0xb   : > { %vm214_vm0 = vcmask 139264   ;;  %vm217_vm1 = vcmask 7168   ;;  %v558_v0 = vmov 0.0   ;;  %vm222_vm2 = vcmask 146568   ;;  %s661_s16 = smov (!%p201_p3, %s513_s16), 1  ;;  %v337_v47 = vld [vmem:[%s657_s2 + $0x8] sm:$0xff] }
   0xc   : > { %215 = vst.msk [vmem:[#allocation2] sm:$0x1] %vm214_vm0, %v558_v0  ;;  %s529_s17 = sshll.u32 %s661_s16, 4  ;;  %vm220_vm3 = vcmask 1024   ;;  %vm225_vm4 = vcmask 140424   ;;  %vm237_vm5 = vcmask 138248   ;;  %355 = vmatpush.msra.mxu0 %v337_v47  ;;  %s213_s11 = scalar_lea.vmem %s659_s4, %s661_s16 }
   0xd   : > { %218 = vst.msk [vmem:[#allocation2] sm:$0xff] %vm217_vm1, %v558_v0  ;;  %s210_s20 = scalar_lea.vmem %s656_s1, %s529_s17  ;;  %vm273_vm6 = vcmask 1046528   ;;  %vm283_vm7 = vcmask 1045504   ;;  %vm298_vm8 = vcmask 1040384   ;;  %vm326_vm9 = vcmask 130049   ;;  %v336_v48 = vld [vmem:[%s657_s2] sm:$0xff]  ;;  %s205_s8 = scalar_lea.vmem %s655_s0, %s529_s17 }
   0xe   : > { %219 = vst.msk [vmem:[#allocation2 + $0x8] sm:$0xff] %vm217_vm1, %v558_v0  ;;  %v227_v1 = vld [vmem:[%s210_s20] sm:$0xff]  ;;  %v228_v2 = vld [vmem:[%s210_s20 + $0x8] sm:$0xff]  ;;  %356 = vmatpush.msra.mxu0 %v336_v48  ;;  %vm330_vm10 = vcmask 122880   ;;  %vm328_vm11 = vcmask 130048   ;;  %vm365_vm12 = vcmask 64512  }
   0xf   : > { %223 = vst.msk [vmem:[#allocation2] sm:$0xff] %vm222_vm2, %v558_v0  ;;  %231 = vrot.lane.b32.xlu0 %v227_v1, %s559_s21  ;;  %v362_v55 = vld [vmem:[%s658_s3] sm:$0xff]  ;;  %v363_v56 = vld [vmem:[%s658_s3 + $0x8] sm:$0xff] }
  0x10   : > { %224 = vst.msk [vmem:[#allocation2 + $0x8] sm:$0xff] %vm222_vm2, %v558_v0  ;;  %v407_v59 = vld [vmem:[%s205_s8] sm:$0xff] }
  0x11   : > { %216 = vst.msk [vmem:[#allocation2 + $0x11] sm:$0x1] %vm214_vm0, %v558_v0  ;;  %v411_v61 = vsub.f32 1.0, %v407_v59 }
  0x12   : > { %221 = vst.msk [vmem:[#allocation2 + $0x10] sm:$0x3] %vm220_vm3, %v558_v0 }
  0x13   : > { %226 = vst.msk [vmem:[#allocation2 + $0x10] sm:$0x3] %vm225_vm4, %v558_v0 }
  0x17   : > { %233 = vrot.lane.b32.xlu0 %v228_v2, %s559_s21  ;;  %v408_v2 = vld [vmem:[%s205_s8 + $0x8] sm:$0xff] }
  0x81   : > { %v232_v3 = vpop.permute.xlu0 %231 }
  0x82   : > { %238 = vst.msk [vmem:[#allocation2 + $0x1] sm:$0xff] %vm237_vm5, %v232_v3 }
  0x89   : > { %v234_v4 = vpop.permute.xlu0 %233  ;;  %v240_v5 = vld [vmem:[#allocation2] sm:$0xff] }
  0x8a   : > { %239 = vst.msk [vmem:[#allocation2 + $0x9] sm:$0xff] %vm237_vm5, %v234_v4  ;;  %246 = vrot.lane.b32.xlu1 %v240_v5, %s560_s22  ;;  %v293_v37 = vmul.f32 9.0, %v240_v5 }
  0x91   : > { %v242_v6 = vld [vmem:[#allocation2 + $0x10] sm:$0x3]  ;;  %v241_v7 = vld [vmem:[#allocation2 + $0x8] sm:$0xff] }
  0x92   : > { %250 = vrot.lane.b32.xlu2 %v242_v6, %s560_s22  ;;  %260 = vrot.lane.b32.xlu0 %v241_v7, %s561_s23  ;;  %v295_v40 = vmul.f32 9.0, %v242_v6  ;;  %v294_v42 = vmul.f32 9.0, %v241_v7 }
  0x93   : > { %248 = vrot.lane.b32.xlu1 %v241_v7, %s560_s22 }
  0x9a   : > { %258 = vrot.lane.b32.xlu2 %v240_v5, %s561_s23 }
  0x9b   : > { %262 = vrot.lane.b32.xlu1 %v242_v6, %s561_s23 }
  0xec   : > { %v251_v8 = vpop.permute.xlu2 %250 }
  0xed   : > { %v257_v20 = vadd.f32 %v251_v8, %v242_v6  ;;  %v412_v6 = vsub.f32 1.0, %v408_v2 }
  0xf4   : > { %v259_v11 = vpop.permute.xlu2 %258 }
  0xfc   : > { %v247_v9 = vpop.permute.xlu1 %246 }
  0xfd   : > { %v255_v10 = vadd.f32 %v247_v9, %v240_v5 }
  0xff   : > { %v267_v13 = vadd.f32 %v259_v11, %v255_v10 }
 0x101   : > { %v274_v17 = vrot.slane %v267_v13, 1  ;;  %v284_v21 = vrot.slane %v267_v13, 2 }
 0x104   : > { %v261_v15 = vpop.permute.xlu0 %260 }
 0x105   : > { %v249_v12 = vpop.permute.xlu1 %248 }
 0x106   : > { %v256_v14 = vadd.f32 %v249_v12, %v241_v7 }
 0x108   : > { %v268_v16 = vadd.f32 %v261_v15, %v256_v14 }
 0x10a   : > { %v275_v18 = vrot.slane %v268_v16, 1  ;;  %v285_v19 = vrot.slane %v268_v16, 2 }
 0x10c   : > { %v276_v22 = vsel %vm273_vm6, %v274_v17, %v275_v18  ;;  %v286_v26 = vsel %vm283_vm7, %v284_v21, %v285_v19 }
 0x10d   : > { %v263_v23 = vpop.permute.xlu1 %262  ;;  %v281_v24 = vadd.f32 %v276_v22, %v267_v13 }
 0x10e   : > { %v269_v25 = vadd.f32 %v263_v23, %v257_v20 }
 0x10f   : > { %v291_v27 = vadd.f32 %v286_v26, %v281_v24 }
 0x110   : > { %v277_v28 = vrot.slane %v269_v25, 1  ;;  %v287_v29 = vrot.slane %v269_v25, 2 }
 0x111   : > { %v299_v30 = vrot.slane %v291_v27, 7 }
 0x112   : > { %v278_v31 = vsel %vm273_vm6, %v275_v18, %v277_v28  ;;  %v288_v33 = vsel %vm283_vm7, %v285_v19, %v287_v29 }
 0x113   : > { %302 = vrot.lane.b32.xlu2 %v299_v30, %s559_s21  ;;  %v282_v32 = vadd.f32 %v278_v31, %v268_v16 }
 0x115   : > { %v292_v34 = vadd.f32 %v288_v33, %v282_v32 }
 0x117   : > { %v300_v35 = vrot.slane %v292_v34, 7 }
 0x119   : > { %306 = vrot.lane.b32.xlu1 %v300_v35, %s559_s21  ;;  %v301_v36 = vsel %vm298_vm8, %v299_v30, %v300_v35 }
 0x11a   : > { %304 = vrot.lane.b32.xlu0 %v301_v36, %s559_s21 }
 0x16d   : > { %v303_v38 = vpop.permute.xlu2 %302 }
 0x16e   : > { %v311_v39 = vsub.f32 %v293_v37, %v303_v38 }
 0x170   : > { %317 = vrot.lane.b32.xlu2 %v311_v39, %s560_s22 }
 0x18b   : > { %v307_v41 = vpop.permute.xlu1 %306 }
 0x18c   : > { %v313_v43 = vsub.f32 %v295_v40, %v307_v41  ;;  %v305_v44 = vpop.permute.xlu0 %304 }
 0x18d   : > { %v312_v45 = vsub.f32 %v294_v42, %v305_v44 }
 0x18e   : > { %321 = vrot.lane.b32.xlu1 %v313_v43, %s560_s22 }
 0x18f   : > { %319 = vrot.lane.b32.xlu0 %v312_v45, %s560_s22 }
 0x1ca   : > { %v318_v46 = vpop.permute.xlu2 %317 }
 0x1cb   : > { %327 = vst.msk [vmem:[#allocation3 - $0x1] sm:$0xfe] %vm326_vm9, %v318_v46 }
 0x200   : > { %v322_v49 = vpop.permute.xlu1 %321 }
 0x201   : > { %331 = vst.msk [vmem:[#allocation3 + $0xf] sm:$0x1] %vm330_vm10, %v322_v49  ;;  %v320_v50 = vpop.permute.xlu0 %319 }
 0x202   : > { %329 = vst.msk [vmem:[#allocation3 + $0x7] sm:$0xff] %vm328_vm11, %v320_v50 }
 0x209   : > { %v333_v51 = vld [vmem:[#allocation3 + $0x1] ss:$2 sm:$0xff] }
 0x20a   : > { %v334_v52 = vmax.f32 %v333_v51, 0.0  ;;  %v395_v58 = vld [vmem:[#allocation3] sm:$0xff]  ;;  %v396_v1 = vld [vmem:[#allocation3 + $0x8] sm:$0xff] }
 0x20b   : > { %vm397_vm13 = vcmp.gt.f32.partialorder %v395_v58, 0.1  ;;  %vm398_vm0 = vcmp.gt.f32.partialorder %v396_v1, 0.1 }
 0x20c   : > { %v335_v53 = vmin.f32 %v334_v52, 1.0 }
 0x20e   : > { %522 = vmatmul.msk.f32.vlgmr.msra.gmra.mxu0 %vm328_vm11, %v335_v53 }
 0x28b   : > { %v358_v54 = vpop.f32.mrf.mxu0 }
 0x28c   : > { %361 = vst.msk [vmem:[#allocation4] sm:$0xff] %vm328_vm11, %v358_v54 }
 0x293   : > { %v364_v57 = vld [vmem:[#allocation4] sm:$0xff] }
 0x294   : > { %387 = vmatpush.msra.mxu1 %v364_v57  ;;  %531 = vmatpush.msra.mxu2 %v364_v57 }
 0x295   : > { %523 = vmatmul.msk.f32.vlgmr.msra.gmra.mxu1 %vm365_vm12, %v362_v55  ;;  %524 = vmatmul.msk.f32.vlgmr.msra.gmra.mxu2 %vm365_vm12, %v363_v56 }
 0x312   : > { %v389_v60 = vpop.f32.mrf.mxu1 }
 0x313   : > { %vm399_vm14 = vcmp.gt.f32.partialorder %v389_v60, 0.1 }
 0x314   : > { %vm401_vm15 = vmor %vm397_vm13, %vm399_vm14 }
 0x315   : > { %v525_v62 = vsel %vm401_vm15, 1.0, %v558_v0 }
 0x316   : > { %v413_v63 = vsub.f32 1.0, %v525_v62  ;;  %v409_v3 = vmul.f32 %v525_v62, %v407_v59  ;;  %v427_v15 = vmul.f32 0.5, %v525_v62 }
 0x318   : > { %v415_v4 = vmul.f32 %v413_v63, %v411_v61  ;;  %v392_v5 = vpop.f32.mrf.mxu2  ;;  %v429_v19 = vsub.f32 0.75, %v427_v15 }
 0x319   : > { %vm400_vm1 = vcmp.gt.f32.partialorder %v392_v5, 0.1 }
 0x31a   : > { %v417_v7 = vadd.f32 %v415_v4, %v409_v3  ;;  %vm402_vm2 = vmor %vm398_vm0, %vm400_vm1 }
 0x31b   : > { %v526_v8 = vsel %vm402_vm2, 1.0, %v558_v0 }
 0x31c   : > { %546 = vlog2.f32 %v417_v7  ;;  %v414_v9 = vsub.f32 1.0, %v526_v8  ;;  %v410_v10 = vmul.f32 %v526_v8, %v408_v2  ;;  %v428_v20 = vmul.f32 0.5, %v526_v8 }
 0x31d   : > { %v433_v22 = vsub.f32 1.0, %v417_v7 }
 0x31e   : > { %v416_v11 = vmul.f32 %v414_v9, %v412_v6  ;;  %v430_v0 = vsub.f32 0.75, %v428_v20 }
 0x31f   : > { %v435_v27 = vmul.f32 %v433_v22, %v433_v22 }
 0x320   : > { %v418_v12 = vadd.f32 %v416_v11, %v410_v10 }
 0x322   : > { %v547_v13 = vpop.eup %546  ;;  %548 = vlog2.f32 %v418_v12  ;;  %v434_v25 = vsub.f32 1.0, %v418_v12 }
 0x323   : > { %v420_v14 = vmul.f32 0.6931472, %v547_v13 }
 0x324   : > { %v436_v29 = vmul.f32 %v434_v25, %v434_v25 }
 0x325   : > { %v423_v16 = vsub.f32 0.0, %v420_v14 }
 0x327   : > { %v425_v17 = vmin.f32 %v423_v16, 100.0 }
 0x328   : > { %v549_v18 = vpop.eup %548 }
 0x329   : > { %v422_v21 = vmul.f32 0.6931472, %v549_v18  ;;  %v431_v24 = vmul.f32 %v429_v19, %v425_v17 }
 0x32b   : > { %v424_v23 = vsub.f32 0.0, %v422_v21  ;;  %v437_v30 = vmul.f32 %v435_v27, %v431_v24 }
 0x32d   : > { %v426_v26 = vmin.f32 %v424_v23, 100.0  ;;  %v439_v32 = vsel %vm328_vm11, %v437_v30, 0.0 }
 0x32f   : > { %v432_v28 = vmul.f32 %v430_v0, %v426_v26 }
 0x331   : > { %v438_v31 = vmul.f32 %v436_v29, %v432_v28 }
 0x333   : > { %v440_v33 = vsel %vm328_vm11, %v438_v31, 0.0 }
 0x334   : > { %v441_v34 = vadd.f32 %v440_v33, %v439_v32 }
 0x336   : > { %442 = vadd.xlane.f32.xlu2 %v441_v34 }
 0x3a9   : > { %v443_v35 = vpop.xlane.xlu2 %442 }
 0x3aa   : > { %v444_v36 = vrot.slane %v443_v35, 4 }
 0x3ac   : > { %v445_v37 = vadd.f32 %v444_v36, %v443_v35 }
 0x3ae   : > { %v446_v38 = vrot.slane %v445_v37, 2 }
 0x3b0   : > { %v447_v39 = vadd.f32 %v446_v38, %v445_v37 }
 0x3b2   : > { %v448_v40 = vrot.slane %v447_v39, 1 }
 0x3b4   : > { %v449_v41 = vadd.f32 %v448_v40, %v447_v39 }
 0x3b6   : > { %532 = vpush %v449_v41 }
 0x3e7   : > { %s533_s12 = spop %532 }
 0x3e8   : > { %v451_v42 = vstv %s533_s12 }
 0x3e9   : > { %453 = vst [vmem:[%s213_s11] sm:$0x1] %v451_v42 }
 0x3ea PF: > { %s14_s15 = sadd.s32 1, %s556_s15  }
 0x3eb   : > { %p11_p4 = scmp.ge.s32.totalorder %s14_s15, 4  }
 0x3ed   :  { %13 = sbr.rel (!%p11_p4) target bundleno = 1 (0x1), region = 70 }

</bundles_post_ra>
